<compile_context>
chip_gen: v7x
topology: tpu7x:2x2x1
jax: 0.10.0
libtpu: 0.0.40
codegen_flags: <defaults>
</compile_context>

<pallas_src>
import jax
import jax.numpy as jnp
from jax.experimental import pallas as pl
from jax.experimental.pallas import tpu as pltpu


def _round_up(n, m):
    return ((n + m - 1) // m) * m


def _classifier_kernel(x1_ref, x2_ref, w1a_ref, w1b_ref, b1_ref, w2_ref, b2_ref, o_ref):
    """out = relu(x1 @ W1a + x2 @ W1b + b1) @ W2 + b2   (dropout = identity, eval mode).

    Activations arrive in f32 straight from HBM and are cast to bf16 here (no wrapper
    round trip); weights are pre-cast bf16; both dots accumulate in f32 on the MXU;
    biases and the output stay f32.
    """
    x1 = x1_ref[...].astype(jnp.bfloat16)
    x2 = x2_ref[...].astype(jnp.bfloat16)
    h = jnp.dot(x1, w1a_ref[...], preferred_element_type=jnp.float32)
    h = h + jnp.dot(x2, w1b_ref[...], preferred_element_type=jnp.float32)
    h = jnp.maximum(h + b1_ref[...], 0.0)                           # bias + ReLU in f32
    out = jnp.dot(h.astype(jnp.bfloat16), w2_ref[...],
                  preferred_element_type=jnp.float32)
    o_ref[...] = (out + b2_ref[...]).astype(o_ref.dtype)


def prepare_classifier_params(params):
    """One-time weight preparation, hoisted out of the per-call forward.

    Splits W1 into its x1/x2 halves (removes the concat), zero-pads mid/out dims to
    lane multiples of 128 (exact math), and casts weights to bf16.  Call once, reuse.
    """
    w1, b1, w2, b2 = params["w1"], params["b1"], params["w2"], params["b2"]
    in_dim, mid = w1.shape
    assert in_dim % 2 == 0, "split=True classifier expects an even input dim (2 * out_feature)"
    feat = in_dim // 2
    out_dim = w2.shape[1]
    mid_p = _round_up(mid, 128)
    out_p = _round_up(out_dim, 128)

    def pad2(a, rows, cols):
        return jnp.pad(a, ((0, rows - a.shape[0]), (0, cols - a.shape[1])))

    return {
        "w1a": pad2(w1[:feat], feat, mid_p).astype(jnp.bfloat16),
        "w1b": pad2(w1[feat:], feat, mid_p).astype(jnp.bfloat16),
        "b1": pad2(b1, 1, mid_p),                                    # f32
        "w2": pad2(w2, mid_p, out_p).astype(jnp.bfloat16),
        "b2": pad2(b2, 1, out_p),                                    # f32
    }


def _pick_batch_tile(batch, block_batch):
    """Batch tile selection.

    Big tiles amortize the ~0.35 us per-grid-step overhead and fill the 256-wide MXU
    on v6e/v7x; block_batch defaults to 512, which keeps the whole working set well
    under the default scoped-VMEM limit on v5e/v6e/v7x at the module's default sizes.
    When the batch is large enough we also keep >= 2 grid steps so the "parallel"
    axis can feed both v7x TensorCores.
    """
    if batch <= block_batch:
        if batch >= 512:
            half = _round_up((batch + 1) // 2, 256)
            if half < batch:
                return half        # two 256-aligned tiles -> megacore gets both cores busy
        return batch               # single full-extent tile; no batch padding needed
    return block_batch


def image_pretrained_model_forward(x1, x2, prepared, *, out_dim, block_batch=512):
    """Equivalent of Image_PreTrained_Model.forward with split=True, pre_loaded=True.

    x1, x2   : [batch, out_feature] pre-computed backbone features (f32 or bf16).
    prepared : output of prepare_classifier_params (padded bf16 weights, f32 biases).
    out_dim  : number of classifier outputs (static under jit).
    """
    w1a, w1b, b1, w2, b2 = (prepared["w1a"], prepared["w1b"], prepared["b1"],
                            prepared["w2"], prepared["b2"])
    batch, feat = x1.shape
    assert x2.shape == (batch, feat)
    assert w1a.shape[0] == feat and w1b.shape[0] == feat
    mid_p = w1a.shape[1]
    out_p = w2.shape[1]

    tb = _pick_batch_tile(batch, block_batch)
    grid = (pl.cdiv(batch, tb),)

    # Weights / biases have a constant block index: single-buffer them so the pipeline
    # doesn't reserve a useless second VMEM copy (frees headroom for bigger batch tiles,
    # most relevant on v7x where VMEM is half that of v5e/v6e).
    def const_spec(shape):
        return pl.BlockSpec(shape, lambda i: (0, 0), pipeline_mode=pl.Buffered(1))

    out_padded = pl.pallas_call(
        _classifier_kernel,
        out_shape=jax.ShapeDtypeStruct((batch, out_p), jnp.float32),
        grid_spec=pltpu.PrefetchScalarGridSpec(
            num_scalar_prefetch=0,
            grid=grid,
            in_specs=[
                pl.BlockSpec((tb, feat), lambda i: (i, 0)),   # x1 tile (full feature extent)
                pl.BlockSpec((tb, feat), lambda i: (i, 0)),   # x2 tile
                const_spec((feat, mid_p)),                    # W1a (resident)
                const_spec((feat, mid_p)),                    # W1b (resident)
                const_spec((1, mid_p)),                       # b1  (resident)
                const_spec((mid_p, out_p)),                   # W2  (resident)
                const_spec((1, out_p)),                       # b2  (resident)
            ],
            out_specs=pl.BlockSpec((tb, out_p), lambda i: (i, 0)),
        ),
        compiler_params=pltpu.CompilerParams(
            # Batch tiles are independent -> shard across TensorCores (v7x megacore).
            dimension_semantics=("parallel",),
        ),
    )(x1, x2, w1a, w1b, b1, w2, b2)

    # Strip lane padding on the class axis.
    return out_padded[:, :out_dim]


def init_params(key, out_feature, mid_nn_layer, output_dim, split=True):
    """Deterministic init mimicking nn.Linear (uniform(-1/sqrt(fan_in), 1/sqrt(fan_in)))."""
    in_dim = out_feature * 2 if split else out_feature
    k1, k2, k3, k4 = jax.random.split(key, 4)
    bound1 = 1.0 / jnp.sqrt(in_dim)
    bound2 = 1.0 / jnp.sqrt(mid_nn_layer)
    return {
        # stored [in, out] (transpose of PyTorch's [out, in]).
        "w1": jax.random.uniform(k1, (in_dim, mid_nn_layer), jnp.float32, -bound1, bound1),
        "b1": jax.random.uniform(k2, (1, mid_nn_layer), jnp.float32, -bound1, bound1),
        "w2": jax.random.uniform(k3, (mid_nn_layer, output_dim), jnp.float32, -bound2, bound2),
        "b2": jax.random.uniform(k4, (1, output_dim), jnp.float32, -bound2, bound2),
    }


def _reference_forward(x1, x2, params):
    """Pure-f32 reference matching the PyTorch module (eval-mode dropout = identity)."""
    x = jnp.concatenate([x1, x2], axis=-1)
    h = jnp.maximum(x @ params["w1"] + params["b1"], 0.0)
    return h @ params["w2"] + params["b2"]


if __name__ == "__main__":
    # Small shapes consistent with the module: per-branch feature dim, mid layer, 5 classes.
    batch = 2
    out_feature = 64       # module default 1000, scaled down for the smoke test
    mid_nn_layer = 128     # module default 512, scaled down
    output_dim = 5

    key = jax.random.PRNGKey(0)
    kx1, kx2, kp = jax.random.split(key, 3)
    x1 = jax.random.normal(kx1, (batch, out_feature), jnp.float32)
    x2 = jax.random.normal(kx2, (batch, out_feature), jnp.float32)
    params = init_params(kp, out_feature, mid_nn_layer, output_dim, split=True)

    # One-time weight prep (cached / reused across forward calls).
    prepared = prepare_classifier_params(params)

    fwd = jax.jit(image_pretrained_model_forward,
                  static_argnames=("out_dim", "block_batch"))

    # --- check 1: tiny batch, single full-extent tile ---
    out = jax.block_until_ready(fwd(x1, x2, prepared, out_dim=output_dim))
    ref = _reference_forward(x1, x2, params)
    assert out.shape == (batch, output_dim)
    # bf16 storage with f32 accumulation -> compare with bf16-level tolerance.
    assert jnp.allclose(out, ref, atol=5e-2, rtol=5e-2), "mismatch vs reference (small batch)"

    # --- check 2: multi-step grid with a partial last batch tile (masked writeback) ---
    batch2 = 24
    x1b = jax.random.normal(jax.random.PRNGKey(1), (batch2, out_feature), jnp.float32)
    x2b = jax.random.normal(jax.random.PRNGKey(2), (batch2, out_feature), jnp.float32)
    out2 = jax.block_until_ready(
        fwd(x1b, x2b, prepared, out_dim=output_dim, block_batch=16))
    ref2 = _reference_forward(x1b, x2b, params)
    assert out2.shape == (batch2, output_dim)
    assert jnp.allclose(out2, ref2, atol=5e-2, rtol=5e-2), "mismatch vs reference (tiled batch)"

    print("KERNEL_OK")
</pallas_src>

<mosaic_0001>
module attributes {stable_mosaic.version = 11 : i64} {
  func.func @_classifier_kernel(%arg0: i32, %arg1: memref<2x64xf32, #tpu.memory_space<vmem>>, %arg2: memref<2x64xf32, #tpu.memory_space<vmem>>, %arg3: memref<64x128xbf16, #tpu.memory_space<vmem>>, %arg4: memref<64x128xbf16, #tpu.memory_space<vmem>>, %arg5: memref<1x128xf32, #tpu.memory_space<vmem>>, %arg6: memref<128x128xbf16, #tpu.memory_space<vmem>>, %arg7: memref<1x128xf32, #tpu.memory_space<vmem>>, %arg8: memref<2x128xf32, #tpu.memory_space<vmem>>) attributes {dimension_semantics = [#tpu.dimension_semantics<parallel>], iteration_bounds = array<i64: 1>, scalar_prefetch = 0 : i64, scratch_operands = 0 : i64, tpu.core_type = #tpu.core_type<tc>, window_params = [{transform_indices = @transform_0, window_bounds = array<i64: 2, 64>}, {transform_indices = @transform_1, window_bounds = array<i64: 2, 64>}, {pipeline_mode = #tpu.pipeline_mode<synchronous>, transform_indices = @transform_2, window_bounds = array<i64: 64, 128>}, {pipeline_mode = #tpu.pipeline_mode<synchronous>, transform_indices = @transform_3, window_bounds = array<i64: 64, 128>}, {pipeline_mode = #tpu.pipeline_mode<synchronous>, transform_indices = @transform_4, window_bounds = array<i64: 1, 128>}, {pipeline_mode = #tpu.pipeline_mode<synchronous>, transform_indices = @transform_5, window_bounds = array<i64: 128, 128>}, {pipeline_mode = #tpu.pipeline_mode<synchronous>, transform_indices = @transform_6, window_bounds = array<i64: 1, 128>}, {transform_indices = @transform_7, window_bounds = array<i64: 2, 128>}]} {
    %c0 = arith.constant 0 : index
    %c0_0 = arith.constant 0 : index
    %0 = vector.load %arg1[%c0, %c0_0] : memref<2x64xf32, #tpu.memory_space<vmem>>, vector<2x64xf32>
    %1 = arith.truncf %0 : vector<2x64xf32> to vector<2x64xbf16>
    %c0_1 = arith.constant 0 : index
    %c0_2 = arith.constant 0 : index
    %2 = vector.load %arg2[%c0_1, %c0_2] : memref<2x64xf32, #tpu.memory_space<vmem>>, vector<2x64xf32>
    %3 = arith.truncf %2 : vector<2x64xf32> to vector<2x64xbf16>
    %c0_3 = arith.constant 0 : index
    %c0_4 = arith.constant 0 : index
    %4 = vector.load %arg3[%c0_3, %c0_4] : memref<64x128xbf16, #tpu.memory_space<vmem>>, vector<64x128xbf16>
    %cst = arith.constant dense<0.000000e+00> : vector<2x128xf32>
    %5 = tpu.matmul %1, %4, %cst {dimension_numbers = #tpu.dot_dimension_numbers<[1], [0], [0], [1], [0, 0, 1, 1], [], []>} : vector<2x64xbf16>, vector<64x128xbf16>, vector<2x128xf32> -> vector<2x128xf32>
    %c0_5 = arith.constant 0 : index
    %c0_6 = arith.constant 0 : index
    %6 = vector.load %arg4[%c0_5, %c0_6] : memref<64x128xbf16, #tpu.memory_space<vmem>>, vector<64x128xbf16>
    %cst_7 = arith.constant dense<0.000000e+00> : vector<2x128xf32>
    %7 = tpu.matmul %3, %6, %cst_7 {dimension_numbers = #tpu.dot_dimension_numbers<[1], [0], [0], [1], [0, 0, 1, 1], [], []>} : vector<2x64xbf16>, vector<64x128xbf16>, vector<2x128xf32> -> vector<2x128xf32>
    %8 = arith.addf %5, %7 : vector<2x128xf32>
    %c0_8 = arith.constant 0 : index
    %c0_9 = arith.constant 0 : index
    %9 = vector.load %arg5[%c0_8, %c0_9] : memref<1x128xf32, #tpu.memory_space<vmem>>, vector<1x128xf32>
    %10 = vector.broadcast %9 : vector<1x128xf32> to vector<2x128xf32>
    %11 = arith.addf %8, %10 : vector<2x128xf32>
    %cst_10 = arith.constant 0.000000e+00 : f32
    %12 = vector.broadcast %cst_10 : f32 to vector<2x128xf32>
    %13 = arith.maximumf %11, %12 : vector<2x128xf32>
    %14 = arith.truncf %13 : vector<2x128xf32> to vector<2x128xbf16>
    %c0_11 = arith.constant 0 : index
    %c0_12 = arith.constant 0 : index
    %15 = vector.load %arg6[%c0_11, %c0_12] : memref<128x128xbf16, #tpu.memory_space<vmem>>, vector<128x128xbf16>
    %cst_13 = arith.constant dense<0.000000e+00> : vector<2x128xf32>
    %16 = tpu.matmul %14, %15, %cst_13 {dimension_numbers = #tpu.dot_dimension_numbers<[1], [0], [0], [1], [0, 0, 1, 1], [], []>} : vector<2x128xbf16>, vector<128x128xbf16>, vector<2x128xf32> -> vector<2x128xf32>
    %c0_14 = arith.constant 0 : index
    %c0_15 = arith.constant 0 : index
    %17 = vector.load %arg7[%c0_14, %c0_15] : memref<1x128xf32, #tpu.memory_space<vmem>>, vector<1x128xf32>
    %18 = vector.broadcast %17 : vector<1x128xf32> to vector<2x128xf32>
    %19 = arith.addf %16, %18 : vector<2x128xf32>
    %c0_16 = arith.constant 0 : index
    %c0_17 = arith.constant 0 : index
    %20 = vector.load %arg8[%c0_16, %c0_17] : memref<2x128xf32, #tpu.memory_space<vmem>>, vector<2x128xf32>
    tpu.vector_store %arg8[%c0_16, %c0_17], %19 {strides = array<i32>} : memref<2x128xf32, #tpu.memory_space<vmem>>, vector<2x128xf32>,
    return
  }
  func.func @transform_0(%arg0: i32) -> (i32, i32) {
    %c0_i32 = arith.constant 0 : i32
    %c0_i32_0 = arith.constant 0 : i32
    return %arg0, %c0_i32 : i32, i32
  }
  func.func @transform_1(%arg0: i32) -> (i32, i32) {
    %c0_i32 = arith.constant 0 : i32
    %c0_i32_0 = arith.constant 0 : i32
    return %arg0, %c0_i32 : i32, i32
  }
  func.func @transform_2(%arg0: i32) -> (i32, i32) {
    %c0_i32 = arith.constant 0 : i32
    %c0_i32_0 = arith.constant 0 : i32
    %c0_i32_1 = arith.constant 0 : i32
    return %c0_i32, %c0_i32_0 : i32, i32
  }
  func.func @transform_3(%arg0: i32) -> (i32, i32) {
    %c0_i32 = arith.constant 0 : i32
    %c0_i32_0 = arith.constant 0 : i32
    %c0_i32_1 = arith.constant 0 : i32
    return %c0_i32, %c0_i32_0 : i32, i32
  }
  func.func @transform_4(%arg0: i32) -> (i32, i32) {
    %c0_i32 = arith.constant 0 : i32
    %c0_i32_0 = arith.constant 0 : i32
    %c0_i32_1 = arith.constant 0 : i32
    return %c0_i32, %c0_i32_0 : i32, i32
  }
  func.func @transform_5(%arg0: i32) -> (i32, i32) {
    %c0_i32 = arith.constant 0 : i32
    %c0_i32_0 = arith.constant 0 : i32
    %c0_i32_1 = arith.constant 0 : i32
    return %c0_i32, %c0_i32_0 : i32, i32
  }
  func.func @transform_6(%arg0: i32) -> (i32, i32) {
    %c0_i32 = arith.constant 0 : i32
    %c0_i32_0 = arith.constant 0 : i32
    %c0_i32_1 = arith.constant 0 : i32
    return %c0_i32, %c0_i32_0 : i32, i32
  }
  func.func @transform_7(%arg0: i32) -> (i32, i32) {
    %c0_i32 = arith.constant 0 : i32
    %c0_i32_0 = arith.constant 0 : i32
    return %arg0, %c0_i32 : i32, i32
  }
}

</mosaic_0001>

<bundles_post_ra>
// kernel: image_pretrained_model_forward.1
= control target key start
LH: loop header
LB: loop body
LE: loop exit
PB: predicated region body
PF: predicated region fallthrough
CT: control target
= control target key end

     0   :  { %12 = vsyncpa [#allocation3], 0  ;;  %s733_s0 = inlined_call_operand.hbm [shape: f32[2,64], index: 0, kind: input, shape index: {}]   ;;  %s734_s1 = inlined_call_operand.vmem [shape: f32[2,64], index: 1, kind: input, shape index: {}]   ;;  %s735_s2 = inlined_call_operand.hbm [shape: bf16[64,128], index: 2, kind: input, shape index: {}]   ;;  %s736_s3 = inlined_call_operand.hbm [shape: bf16[64,128], index: 3, kind: input, shape index: {}]   ;;  %s737_s4 = inlined_call_operand.vmem [shape: f32[1,128], index: 4, kind: input, shape index: {}]   ;;  %s738_s5 = inlined_call_operand.hbm [shape: bf16[128,128], index: 5, kind: input, shape index: {}]   ;;  %s739_s6 = inlined_call_operand.vmem [shape: f32[1,128], index: 6, kind: input, shape index: {}]   ;;  %s740_s7 = inlined_call_operand.hbm [shape: f32[2,128], index: 7, kind: output, shape index: {}]  }
   0x1   :  { %13 = vsyncpa [#allocation6], 0 }
   0x2   :  { %14 = vsyncpa [#allocation9], 0 }
   0x3   :  { %15 = vsyncpa [#allocation4], 0  ;;  %s601_s24 = smov [#allocation5]   ;;  %s483_s28 = scalar_lea.hbm %s735_s2, 512 }
   0x4   :  { %s33_s25 = sshll.u32 %s601_s24, 4  ;;  %p484_p0 = scmp.ne.s32.totalorder %s735_s2, %s483_s28  ;;  %s34_s25 = int_to_ptr.vmem [resolvable:$true] %s33_s25 }
   0x5   :  { %p487_p1 = scmp.lt.u32.totalorder %s483_s28, %s735_s2 }
   0x7   :  { %p489_p2 = pnand %p487_p1, %p484_p0 }
   0x9   :  { %492 = shalt.err (!%p489_p2)
}
   0xa   :  { %s493_s10 = scalar_lea.vmem %s34_s25, 512  ;;  %p498_p4 = scmp.lt.s32.totalorder %s34_s25, %s34_s25 }
   0xb   :  { %p494_p3 = scmp.ne.s32.totalorder %s34_s25, %s493_s10  ;;  %p499_p5 = scmp.lt.s32.totalorder %s493_s10, %s493_s10 }
   0xd   :  { %p500_p6 = por %p499_p5, %p498_p4 }
   0xf   :  { %p501_p7 = pnand %p500_p6, %p494_p3 }
  0x11   :  { %504 = shalt.err (!%p501_p7)
}
  0x12   :  { %s602_s11 = smov 64   ;;  %s603_s12 = smov 4  }
  0x13   :  { %39 = dma.hbm_to_vmem [thread:$0]  %s735_s2, 512, %s34_s25, [#allocation6], %s602_s11, %s602_s11, %s603_s12  }
  0x14   :  { %s604_s15 = smov [#allocation2]   ;;  %s605_s17 = smov [#allocation7]  }
  0x15   :  { %s22_s16 = sshll.u32 %s604_s15, 4  ;;  %s45_s18 = sshll.u32 %s605_s17, 4  ;;  %s23_s16 = int_to_ptr.vmem [resolvable:$true] %s22_s16  ;;  %s46_s18 = int_to_ptr.vmem [resolvable:$true] %s45_s18 }
  0x16   :  { %s505_s21 = scalar_lea.hbm %s733_s0, 32 }
  0x17   :  { %p506_p8 = scmp.ne.s32.totalorder %s733_s0, %s505_s21  ;;  %p509_p9 = scmp.lt.u32.totalorder %s505_s21, %s733_s0 }
  0x19   :  { %p511_p10 = pnand %p509_p9, %p506_p8 }
  0x1b   :  { %514 = shalt.err (!%p511_p10)
}
  0x1c   :  { %s515_s2 = scalar_lea.vmem %s23_s16, 32  ;;  %p520_p12 = scmp.lt.s32.totalorder %s23_s16, %s23_s16 }
  0x1d   :  { %p516_p11 = scmp.ne.s32.totalorder %s23_s16, %s515_s2  ;;  %p521_p13 = scmp.lt.s32.totalorder %s515_s2, %s515_s2 }
  0x1f   :  { %p522_p0 = por %p521_p13, %p520_p12 }
  0x21   :  { %p523_p1 = pnand %p522_p0, %p516_p11 }
  0x23   :  { %526 = shalt.err (!%p523_p1)
}
  0x24   :  { %25 = dma.hbm_to_vmem [thread:$0]  %s733_s0, 32, %s23_s16, [#allocation3]  }
  0x25   :  { %s527_s30 = scalar_lea.hbm %s736_s3, 512 }
  0x26   :  { %p528_p2 = scmp.ne.s32.totalorder %s736_s3, %s527_s30  ;;  %p531_p3 = scmp.lt.u32.totalorder %s527_s30, %s736_s3 }
  0x28   :  { %p533_p4 = pnand %p531_p3, %p528_p2 }
  0x2a   :  { %536 = shalt.err (!%p533_p4)
}
  0x2b   :  { %s537_s14 = scalar_lea.vmem %s46_s18, 512  ;;  %p542_p6 = scmp.lt.s32.totalorder %s46_s18, %s46_s18 }
  0x2c   :  { %p538_p5 = scmp.ne.s32.totalorder %s46_s18, %s537_s14  ;;  %p543_p7 = scmp.lt.s32.totalorder %s537_s14, %s537_s14 }
  0x2e   :  { %p544_p8 = por %p543_p7, %p542_p6 }
  0x30   :  { %p545_p9 = pnand %p544_p8, %p538_p5 }
  0x32   :  { %548 = shalt.err (!%p545_p9)
}
  0x33   :  { %51 = dma.hbm_to_vmem [thread:$0]  %s736_s3, 512, %s46_s18, [#allocation6], %s602_s11, %s602_s11, %s603_s12  }
  0x34   :  { %s606_s16 = smov [#allocation8]   ;;  %s549_s21 = scalar_lea.hbm %s738_s5, 1024 }
  0x35   :  { %s59_s17 = sshll.u32 %s606_s16, 4  ;;  %p550_p10 = scmp.ne.s32.totalorder %s738_s5, %s549_s21  ;;  %s60_s17 = int_to_ptr.vmem [resolvable:$true] %s59_s17 }
  0x36   :  { %p553_p11 = scmp.lt.u32.totalorder %s549_s21, %s738_s5 }
  0x38   :  { %p555_p12 = pnand %p553_p11, %p550_p10 }
  0x3a   :  { %558 = shalt.err (!%p555_p12)
}
  0x3b   :  { %s559_s2 = scalar_lea.vmem %s60_s17, 1024  ;;  %p564_p0 = scmp.lt.s32.totalorder %s60_s17, %s60_s17 }
  0x3c   :  { %p560_p13 = scmp.ne.s32.totalorder %s60_s17, %s559_s2  ;;  %p565_p1 = scmp.lt.s32.totalorder %s559_s2, %s559_s2 }
  0x3e   :  { %p566_p2 = por %p565_p1, %p564_p0 }
  0x40   :  { %p567_p3 = pnand %p566_p2, %p560_p13 }
  0x42   :  { %570 = shalt.err (!%p567_p3)
}
  0x43   :  { %65 = dma.hbm_to_vmem [thread:$0]  %s738_s5, 1024, %s60_s17, [#allocation9], %s602_s11, %s602_s11, %s603_s12  }
  0x44   :  { %593 = dma.done.wait [#allocation3], 32  }
  0x45   :  { %594 = vsyncadd [#allocation3], 4294967264 }
  0x46   :  { %595 = dma.done.wait [#allocation6], 1024  }
  0x47   :  { %596 = vsyncadd [#allocation6], 4294966272 }
  0x48   :  { %597 = dma.done.wait [#allocation9], 1024  }
  0x49   :  { %598 = vsyncadd [#allocation9], 4294966272  ;;  %v607_v0 = vmov 0.0   ;;  %vm608_vm0 = vmmov 0   ;;  %v467_v1 = vld [vmem:[#allocation7] sm:$0xff]   ;;  %v468_v2 = vld [vmem:[#allocation7 + $0x8] sm:$0xff]  }
  0x4a   :  { %414 = vmatprep.subr.bf16.mxu1 %v607_v0  ;;  %422 = vmatprep.mubr.msk.bf16.mxu1 %vm608_vm0, %v607_v0  ;;  %v469_v3 = vld [vmem:[#allocation7 + $0x10] sm:$0xff]   ;;  %v470_v4 = vld [vmem:[#allocation7 + $0x18] sm:$0xff]   ;;  %v475_v6 = vld [vmem:[#allocation8] sm:$0xff]   ;;  %vm125_vm1 = vcmask 523264   ;;  %s609_s28 = smov [#allocation10]  }
  0x4b   :  { %438 = vmatprep.subr.bf16.mxu0 %v607_v0  ;;  %454 = vmatprep.mubr.msk.bf16.mxu0 %vm608_vm0, %v607_v0  ;;  %v83_v5 = vld [vmem:[%s734_s1] sm:$0x3]  ;;  %v476_v7 = vld [vmem:[#allocation8 + $0x8] sm:$0xff]   ;;  %v471_v9 = vld [vmem:[#allocation5] sm:$0xff]   ;;  %s364_s29 = sshll.u32 %s609_s28, 4  ;;  %s365_s29 = int_to_ptr.vmem [resolvable:$true] %s364_s29 }
  0x4c   :  { %415 = vmatpush3.bf16.msra.mxu1 %v467_v1  ;;  %439 = vmatpush3.bf16.msra.mxu0 %v475_v6  ;;  %v84_v8 = vpack.c.bf16 %v83_v5, %v83_v5  ;;  %v472_v10 = vld [vmem:[#allocation5 + $0x8] sm:$0xff]   ;;  %v473_v11 = vld [vmem:[#allocation5 + $0x10] sm:$0xff]   ;;  %v474_v12 = vld [vmem:[#allocation5 + $0x18] sm:$0xff]   ;;  %p576_p5 = scmp.lt.s32.totalorder %s365_s29, %s365_s29 }
  0x4d   :  { %416 = vmatprep.subr.bf16.mxu1 %v607_v0  ;;  %440 = vmatprep.subr.bf16.mxu0 %v607_v0  ;;  %v81_v13 = vld [vmem:[#allocation2] sm:$0x3]  ;;  %v477_v15 = vld [vmem:[#allocation8 + $0x10] sm:$0xff]   ;;  %v479_v17 = vld [vmem:[#allocation8 + $0x20] sm:$0xff]  }
  0x4e   :  { %v82_v14 = vpack.c.bf16 %v81_v13, %v81_v13  ;;  %v478_v16 = vld [vmem:[#allocation8 + $0x18] sm:$0xff]   ;;  %v480_v18 = vld [vmem:[#allocation8 + $0x28] sm:$0xff]   ;;  %v481_v19 = vld [vmem:[#allocation8 + $0x30] sm:$0xff]  }
  0x4f   :  { %v482_v20 = vld [vmem:[#allocation8 + $0x38] sm:$0xff]  }
  0x50   :  { %417 = vmatpush3.bf16.msra.mxu1 %v468_v2  ;;  %441 = vmatpush3.bf16.msra.mxu0 %v476_v7  ;;  %v385_v26 = vld [vmem:[%s737_s4] ss:$0 sm:$0xff]  ;;  %s571_s4 = scalar_lea.vmem %s365_s29, 32 }
  0x51   :  { %418 = vmatprep.subr.bf16.mxu1 %v607_v0  ;;  %442 = vmatprep.subr.bf16.mxu0 %v607_v0  ;;  %v386_v34 = vld [vmem:[%s739_s6] ss:$0 sm:$0xff]  ;;  %p572_p4 = scmp.ne.s32.totalorder %s365_s29, %s571_s4  ;;  %p577_p6 = scmp.lt.s32.totalorder %s571_s4, %s571_s4 }
  0x53   :  { %p578_p7 = por %p577_p6, %p576_p5 }
  0x54   :  { %419 = vmatpush3.bf16.msra.mxu1 %v469_v3  ;;  %443 = vmatpush3.bf16.msra.mxu0 %v477_v15 }
  0x55   :  { %420 = vmatprep.subr.bf16.mxu1 %v607_v0  ;;  %444 = vmatprep.subr.bf16.mxu0 %v607_v0  ;;  %p579_p8 = pnand %p578_p7, %p572_p4 }
  0x58   :  { %421 = vmatpush3.bf16.msra.mxu1 %v470_v4  ;;  %445 = vmatpush3.bf16.msra.mxu0 %v478_v16 }
  0x59   :  { %426 = vmatprep.subr.bf16.mxu1 %v607_v0  ;;  %446 = vmatprep.subr.bf16.mxu0 %v607_v0 }
  0x5b   :  { %423 = vmatmul.mubr.msk.bf16.vlgmr.msra.gmra.mrb[0].mxu1 %vm125_vm1, %v84_v8 }
  0x5c   :  { %427 = vmatpush3.bf16.msra.mxu1 %v471_v9  ;;  %434 = vmatprep.mubr.msk.bf16.mxu1 %vm608_vm0, %v607_v0 }
  0x5d   :  { %428 = vmatprep.subr.bf16.mxu1 %v607_v0  ;;  %447 = vmatpush3.bf16.msra.mxu0 %v479_v17 }
  0x5e   :  { %448 = vmatprep.subr.bf16.mxu0 %v607_v0 }
  0x60   :  { %429 = vmatpush3.bf16.msra.mxu1 %v472_v10 }
  0x61   :  { %430 = vmatprep.subr.bf16.mxu1 %v607_v0  ;;  %449 = vmatpush3.bf16.msra.mxu0 %v480_v18 }
  0x62   :  { %450 = vmatprep.subr.bf16.mxu0 %v607_v0 }
  0x64   :  { %431 = vmatpush3.bf16.msra.mxu1 %v473_v11 }
  0x65   :  { %432 = vmatprep.subr.bf16.mxu1 %v607_v0  ;;  %451 = vmatpush3.bf16.msra.mxu0 %v481_v19 }
  0x66   :  { %452 = vmatprep.subr.bf16.mxu0 %v607_v0 }
  0x68   :  { %433 = vmatpush3.bf16.msra.mxu1 %v474_v12 }
  0x69   :  { %453 = vmatpush3.bf16.msra.mxu0 %v482_v20 }
  0x6b   :  { %435 = vmatmul.mubr.msk.bf16.vlgmr.msra.gmra.mrb[4].mxu1 %vm125_vm1, %v82_v14 }
 0x12e   :  { %v163_v21 = vpop.f32.mrb[0].mxu1 }
 0x12f   :  { %v424_v22 = vpop.f32.mrb[1].mxu1 }
 0x130   :  { %v166_v23 = vpop.f32.mrb[2].mxu1 }
 0x131   :  { %v425_v24 = vpop.f32.mrb[3].mxu1 }
 0x13e   :  { %v230_v25 = vpop.f32.mrb[4].mxu1 }
 0x13f   :  { %v231_v27 = vadd.f32 %v230_v25, %v163_v21  ;;  %v436_v28 = vpop.f32.mrb[5].mxu1 }
 0x140   :  { %v233_v29 = vpop.f32.mrb[6].mxu1 }
 0x141   :  { %v243_v30 = vadd.f32 %v385_v26, %v231_v27  ;;  %v437_v31 = vpop.f32.mrb[7].mxu1 }
 0x143   :  { %v244_v32 = vmax.f32 %v243_v30, 0.0 }
 0x145   :  { %v245_v33 = vpack.c.bf16 %v244_v32, %v244_v32 }
 0x147   :  { %455 = vmatmul.mubr.bf16.vlgmr.msra.gmra.mrb[0].mxu0 %v245_v33 }
 0x21a   :  { %v351_v35 = vpop.f32.mrb[0].mxu0 }
 0x21b   :  { %v352_v36 = vadd.f32 %v386_v34, %v351_v35  ;;  %v456_v37 = vpop.f32.mrb[1].mxu0 }
 0x21c   :  { %v354_v38 = vpop.f32.mrb[2].mxu0 }
 0x21d   :  { %357 = vst [vmem:[#allocation10] sm:$0x3] %v352_v36  ;;  %v457_v39 = vpop.f32.mrb[3].mxu0 }
 0x21e   :  { %582 = shalt.err (!%p579_p8)
}
 0x21f   :  { %s583_s6 = scalar_lea.hbm %s740_s7, 32 }
 0x220   :  { %p584_p9 = scmp.ne.s32.totalorder %s740_s7, %s583_s6  ;;  %p587_p10 = scmp.lt.u32.totalorder %s583_s6, %s740_s7 }
 0x222   :  { %p589_p11 = pnand %p587_p10, %p584_p9 }
 0x224   :  { %592 = shalt.err (!%p589_p11)
}
 0x225   :  { %367 = dma.vmem_to_hbm [thread:$0]  %s365_s29, 32, %s740_s7, [#allocation4]  }
 0x226   :  { %599 = dma.done.wait [#allocation4], 32  }
 0x227   :  { %600 = vsyncadd [#allocation4], 4294967264 }
 0x228   :  { %371 = vsyncpa [#allocation3], 1 }
 0x229   :  { %372 = vsyncpa [#allocation6], 1 }
 0x22a   :  { %373 = vsyncpa [#allocation9], 1 }
 0x22b   :  { %374 = vsyncpa [#allocation4], 1 }

</bundles_post_ra>
